<compile_context>
chip_gen: v6e
topology: v6e:2x2x1
jax: 0.10.0
libtpu: 0.0.40
codegen_flags: <defaults>
</compile_context>

<pallas_src>
import jax
import jax.numpy as jnp
from jax.experimental import pallas as pl
from jax.experimental.pallas import tpu as pltpu

LN_EPS = 1e-5


def resblock1d_kernel(x_ref, w1_ref, w2_ref, ln_ref, o_ref):
    # x_ref / o_ref : (N, C*L)   f32 lane-dense activations (one 128-lane row per sample)
    # w1_ref/w2_ref : (C*L, C*L) bf16 dense band matrices implementing Conv1d(k=3, pad=1)
    # ln_ref        : (4, C*L)   f32 rows = [ln1.weight, ln1.bias, ln2.weight, ln2.bias]
    x = x_ref[...].astype(jnp.float32)       # (N, CL)
    ln = ln_ref[...]                          # (4, CL), already f32

    def ln_relu(v, g, b):
        # LayerNorm over each sample's full (C, L) block == over the C*L lanes of
        # its row: last-axis reductions (XLU) + rsqrt (EUP) + affine/ReLU (VPU),
        # all in f32 (v5e has no bf16 VPU/EUP).
        mu = jnp.mean(v, axis=1, keepdims=True)
        var = jnp.mean(jnp.square(v - mu), axis=1, keepdims=True)
        vn = (v - mu) * jax.lax.rsqrt(var + LN_EPS)
        return jnp.maximum(vn * g + b, 0.0)

    # relu(ln1(x)) -> conv1 as ONE bf16 MXU matmul with f32 accumulation.
    y = ln_relu(x, ln[0:1], ln[1:2])
    y = jnp.dot(y.astype(jnp.bfloat16), w1_ref[...],
                preferred_element_type=jnp.float32)
    # relu(ln2(.)) -> conv2 as ONE bf16 MXU matmul with f32 accumulation.
    y = ln_relu(y, ln[2:3], ln[3:4])
    y = jnp.dot(y.astype(jnp.bfloat16), w2_ref[...],
                preferred_element_type=jnp.float32)
    # Residual add with the pre-LN input; dense 128-lane store.
    o_ref[...] = (y + x).astype(o_ref.dtype)


def _conv1d_as_dense_matrix(w, L):
    """PyTorch Conv1d weight (C_out, C_in, K), stride=1, padding=K//2, no bias ->
    dense (C_in*L, C_out*L) matrix M such that  y_flat = x_flat @ M,
    where x_flat / y_flat are row-major flattenings of the (C, L) blocks."""
    c_out, c_in, K = w.shape
    lo = jnp.arange(L)[None, :]                 # (1, L) output position
    li = jnp.arange(L)[:, None]                 # (L, 1) input position
    k = li - lo + (K // 2)                      # tap index per (li, lo)
    valid = (k >= 0) & (k < K)
    k_c = jnp.clip(k, 0, K - 1)
    w_t = jnp.transpose(w, (1, 0, 2))           # (C_in, C_out, K): w_t[i, o, k] = w[o, i, k]
    band = jnp.where(valid[None, None], w_t[:, :, k_c], 0.0)   # (C_in, C_out, L, L)
    return jnp.transpose(band, (0, 2, 1, 3)).reshape(c_in * L, c_out * L)


def prepare_resblock1d_params(w1, w2, g1, b1, g2, b2):
    """One-time (init-time) re-layout of the module parameters.

    Hoisted out of the per-forward path: the gather-heavy band-matrix construction
    is more expensive than the kernel itself, so it must not run per call.
    Returns (w1m_bf16, w2m_bf16, ln_all_f32)."""
    C = w1.shape[0]
    L = g1.shape[-1]
    w1m = _conv1d_as_dense_matrix(w1, L).astype(jnp.bfloat16)
    w2m = _conv1d_as_dense_matrix(w2, L).astype(jnp.bfloat16)
    ln_all = jnp.stack([g1, b1, g2, b2]).reshape(4, C * L).astype(jnp.float32)
    return w1m, w2m, ln_all


@jax.jit
def resblock1d_apply(x, w1m, w2m, ln_all):
    """Per-forward path: x (N, C, L) f32, prebuilt bf16 band matrices + f32 LN params."""
    N, C, L = x.shape
    CL = C * L
    x_flat = x.reshape(N, CL)               # lane-dense: one C*L-lane row per sample
    vmem = pltpu.MemorySpace.VMEM
    out_flat = pl.pallas_call(
        resblock1d_kernel,
        out_shape=jax.ShapeDtypeStruct((N, CL), x.dtype),
        # Grid-less single invocation; whole working set is VMEM-resident.
        in_specs=[
            pl.BlockSpec(memory_space=vmem),   # x_flat
            pl.BlockSpec(memory_space=vmem),   # w1m (bf16)
            pl.BlockSpec(memory_space=vmem),   # w2m (bf16)
            pl.BlockSpec(memory_space=vmem),   # ln_all
        ],
        out_specs=pl.BlockSpec(memory_space=vmem),
        # x_flat and the output share shape/dtype and x is fully read before the
        # final store -> alias to skip a separate HBM output allocation.
        input_output_aliases={0: 0},
    )(x_flat, w1m, w2m, ln_all)
    return out_flat.reshape(N, C, L)


def resblock1d_ref(x, w1, w2, g1, b1, g2, b2):
    """Pure-JAX f32 reference matching the PyTorch forward."""
    def ln(v, g, b):
        mu = jnp.mean(v, axis=(1, 2), keepdims=True)
        var = jnp.mean(jnp.square(v - mu), axis=(1, 2), keepdims=True)
        return (v - mu) / jnp.sqrt(var + LN_EPS) * g + b

    def conv(v, w):
        return jax.lax.conv_general_dilated(
            v, w, window_strides=(1,), padding=[(1, 1)],
            dimension_numbers=("NCH", "OIH", "NCH"))

    y = jax.nn.relu(ln(x, g1, b1))
    y = conv(y, w1)
    y = jax.nn.relu(ln(y, g2, b2))
    y = conv(y, w2)
    return y + x


if __name__ == "__main__":
    # ResBlock1D(inplanes=planes=8, seq_len=16, stride=1)  -> C*L = 128 (one vreg row).
    # N=8 so the matmul LHS fills all 8 sublanes of the MXU tile.
    N, C, L = 8, 8, 16
    key = jax.random.PRNGKey(0)
    kx, kw1, kw2 = jax.random.split(key, 3)

    x = jax.random.normal(kx, (N, C, L), dtype=jnp.float32)
    # Conv1d weights: (out_ch, in_ch, kernel=3), bias=False
    w1 = 0.1 * jax.random.normal(kw1, (C, C, 3), dtype=jnp.float32)
    w2 = 0.1 * jax.random.normal(kw2, (C, C, 3), dtype=jnp.float32)
    # LayerNorm([planes, seq_len]) affine params (PyTorch default init)
    g1 = jnp.ones((C, L), jnp.float32)
    b1 = jnp.zeros((C, L), jnp.float32)
    g2 = jnp.ones((C, L), jnp.float32)
    b2 = jnp.zeros((C, L), jnp.float32)

    # One-time parameter re-layout (outside the hot per-forward path).
    params = jax.block_until_ready(prepare_resblock1d_params(w1, w2, g1, b1, g2, b2))

    out = jax.block_until_ready(resblock1d_apply(x, *params))

    ref = resblock1d_ref(x, w1, w2, g1, b1, g2, b2)
    assert out.shape == (N, C, L)
    # bf16 MXU weights/LHS -> compare against the f32 reference with a looser tolerance.
    assert jnp.allclose(out, ref, atol=2e-2, rtol=2e-2), "mismatch vs reference"

    print("KERNEL_OK")
</pallas_src>

<mosaic_0001>
module attributes {stable_mosaic.version = 11 : i64} {
  func.func @resblock1d_kernel(%arg0: memref<8x128xf32, #tpu.memory_space<vmem>>, %arg1: memref<128x128xbf16, #tpu.memory_space<vmem>>, %arg2: memref<128x128xbf16, #tpu.memory_space<vmem>>, %arg3: memref<4x128xf32, #tpu.memory_space<vmem>>, %arg4: memref<8x128xf32, #tpu.memory_space<vmem>>) attributes {dimension_semantics = [], scalar_prefetch = 0 : i64, scratch_operands = 0 : i64, tpu.core_type = #tpu.core_type<tc>} {
    %c0 = arith.constant 0 : index
    %c0_0 = arith.constant 0 : index
    %0 = vector.load %arg0[%c0, %c0_0] : memref<8x128xf32, #tpu.memory_space<vmem>>, vector<8x128xf32>
    %c0_1 = arith.constant 0 : index
    %c0_2 = arith.constant 0 : index
    %1 = vector.load %arg3[%c0_1, %c0_2] : memref<4x128xf32, #tpu.memory_space<vmem>>, vector<4x128xf32>
    %2 = vector.extract_strided_slice %1 {offsets = [0, 0], sizes = [1, 128], strides = [1, 1]} : vector<4x128xf32> to vector<1x128xf32>
    %3 = vector.extract_strided_slice %1 {offsets = [1, 0], sizes = [1, 128], strides = [1, 1]} : vector<4x128xf32> to vector<1x128xf32>
    %cst = arith.constant dense<0.000000e+00> : vector<8xf32>
    %4 = vector.multi_reduction <add>, %0, %cst [1] : vector<8x128xf32> to vector<8xf32>
    %5 = vector.shape_cast %4 : vector<8xf32> to vector<8x1xf32>
    %cst_3 = arith.constant 1.280000e+02 : f32
    %6 = vector.broadcast %cst_3 : f32 to vector<8x1xf32>
    %7 = arith.divf %5, %6 : vector<8x1xf32>
    %8 = vector.broadcast %7 : vector<8x1xf32> to vector<8x128xf32>
    %9 = arith.subf %0, %8 : vector<8x128xf32>
    %10 = arith.mulf %9, %9 : vector<8x128xf32>
    %cst_4 = arith.constant dense<0.000000e+00> : vector<8xf32>
    %11 = vector.multi_reduction <add>, %10, %cst_4 [1] : vector<8x128xf32> to vector<8xf32>
    %12 = vector.shape_cast %11 : vector<8xf32> to vector<8x1xf32>
    %cst_5 = arith.constant 1.280000e+02 : f32
    %13 = vector.broadcast %cst_5 : f32 to vector<8x1xf32>
    %14 = arith.divf %12, %13 : vector<8x1xf32>
    %15 = vector.broadcast %7 : vector<8x1xf32> to vector<8x128xf32>
    %16 = arith.subf %0, %15 : vector<8x128xf32>
    %cst_6 = arith.constant 9.99999974E-6 : f32
    %17 = vector.broadcast %cst_6 : f32 to vector<8x1xf32>
    %18 = arith.addf %14, %17 : vector<8x1xf32>
    %19 = math.rsqrt %18 : vector<8x1xf32>
    %20 = vector.broadcast %19 : vector<8x1xf32> to vector<8x128xf32>
    %21 = arith.mulf %16, %20 : vector<8x128xf32>
    %22 = vector.broadcast %2 : vector<1x128xf32> to vector<8x128xf32>
    %23 = arith.mulf %21, %22 : vector<8x128xf32>
    %24 = vector.broadcast %3 : vector<1x128xf32> to vector<8x128xf32>
    %25 = arith.addf %23, %24 : vector<8x128xf32>
    %cst_7 = arith.constant 0.000000e+00 : f32
    %26 = vector.broadcast %cst_7 : f32 to vector<8x128xf32>
    %27 = arith.maximumf %25, %26 : vector<8x128xf32>
    %28 = arith.truncf %27 : vector<8x128xf32> to vector<8x128xbf16>
    %c0_8 = arith.constant 0 : index
    %c0_9 = arith.constant 0 : index
    %29 = vector.load %arg1[%c0_8, %c0_9] : memref<128x128xbf16, #tpu.memory_space<vmem>>, vector<128x128xbf16>
    %cst_10 = arith.constant dense<0.000000e+00> : vector<8x128xf32>
    %30 = tpu.matmul %28, %29, %cst_10 {dimension_numbers = #tpu.dot_dimension_numbers<[1], [0], [0], [1], [0, 0, 1, 1], [], []>} : vector<8x128xbf16>, vector<128x128xbf16>, vector<8x128xf32> -> vector<8x128xf32>
    %31 = vector.extract_strided_slice %1 {offsets = [2, 0], sizes = [1, 128], strides = [1, 1]} : vector<4x128xf32> to vector<1x128xf32>
    %32 = vector.extract_strided_slice %1 {offsets = [3, 0], sizes = [1, 128], strides = [1, 1]} : vector<4x128xf32> to vector<1x128xf32>
    %cst_11 = arith.constant dense<0.000000e+00> : vector<8xf32>
    %33 = vector.multi_reduction <add>, %30, %cst_11 [1] : vector<8x128xf32> to vector<8xf32>
    %34 = vector.shape_cast %33 : vector<8xf32> to vector<8x1xf32>
    %cst_12 = arith.constant 1.280000e+02 : f32
    %35 = vector.broadcast %cst_12 : f32 to vector<8x1xf32>
    %36 = arith.divf %34, %35 : vector<8x1xf32>
    %37 = vector.broadcast %36 : vector<8x1xf32> to vector<8x128xf32>
    %38 = arith.subf %30, %37 : vector<8x128xf32>
    %39 = arith.mulf %38, %38 : vector<8x128xf32>
    %cst_13 = arith.constant dense<0.000000e+00> : vector<8xf32>
    %40 = vector.multi_reduction <add>, %39, %cst_13 [1] : vector<8x128xf32> to vector<8xf32>
    %41 = vector.shape_cast %40 : vector<8xf32> to vector<8x1xf32>
    %cst_14 = arith.constant 1.280000e+02 : f32
    %42 = vector.broadcast %cst_14 : f32 to vector<8x1xf32>
    %43 = arith.divf %41, %42 : vector<8x1xf32>
    %44 = vector.broadcast %36 : vector<8x1xf32> to vector<8x128xf32>
    %45 = arith.subf %30, %44 : vector<8x128xf32>
    %cst_15 = arith.constant 9.99999974E-6 : f32
    %46 = vector.broadcast %cst_15 : f32 to vector<8x1xf32>
    %47 = arith.addf %43, %46 : vector<8x1xf32>
    %48 = math.rsqrt %47 : vector<8x1xf32>
    %49 = vector.broadcast %48 : vector<8x1xf32> to vector<8x128xf32>
    %50 = arith.mulf %45, %49 : vector<8x128xf32>
    %51 = vector.broadcast %31 : vector<1x128xf32> to vector<8x128xf32>
    %52 = arith.mulf %50, %51 : vector<8x128xf32>
    %53 = vector.broadcast %32 : vector<1x128xf32> to vector<8x128xf32>
    %54 = arith.addf %52, %53 : vector<8x128xf32>
    %cst_16 = arith.constant 0.000000e+00 : f32
    %55 = vector.broadcast %cst_16 : f32 to vector<8x128xf32>
    %56 = arith.maximumf %54, %55 : vector<8x128xf32>
    %57 = arith.truncf %56 : vector<8x128xf32> to vector<8x128xbf16>
    %c0_17 = arith.constant 0 : index
    %c0_18 = arith.constant 0 : index
    %58 = vector.load %arg2[%c0_17, %c0_18] : memref<128x128xbf16, #tpu.memory_space<vmem>>, vector<128x128xbf16>
    %cst_19 = arith.constant dense<0.000000e+00> : vector<8x128xf32>
    %59 = tpu.matmul %57, %58, %cst_19 {dimension_numbers = #tpu.dot_dimension_numbers<[1], [0], [0], [1], [0, 0, 1, 1], [], []>} : vector<8x128xbf16>, vector<128x128xbf16>, vector<8x128xf32> -> vector<8x128xf32>
    %60 = arith.addf %59, %0 : vector<8x128xf32>
    %c0_20 = arith.constant 0 : index
    %c0_21 = arith.constant 0 : index
    %61 = vector.load %arg4[%c0_20, %c0_21] : memref<8x128xf32, #tpu.memory_space<vmem>>, vector<8x128xf32>
    tpu.vector_store %arg4[%c0_20, %c0_21], %60 {strides = array<i32>} : memref<8x128xf32, #tpu.memory_space<vmem>>, vector<8x128xf32>,
    return
  }
}

</mosaic_0001>

<bundles_post_ra>
// kernel: resblock1d_apply.1
= control target key start
LH: loop header
LB: loop body
LE: loop exit
PB: predicated region body
PF: predicated region fallthrough
CT: control target
= control target key end

     0   :  { %9 = vsyncpa [#allocation3], 0  ;;  %s416_s15 = smov [#allocation2]   ;;  %s505_s0 = inlined_call_operand.vmem [shape: f32[8,128], index: 0, kind: input, shape index: {}, may-alias: {0,4}]   ;;  %s506_s1 = inlined_call_operand.vmem [shape: bf16[128,128], index: 1, kind: input, shape index: {}]   ;;  %s507_s2 = inlined_call_operand.hbm [shape: bf16[128,128], index: 2, kind: input, shape index: {}]   ;;  %s508_s3 = inlined_call_operand.vmem [shape: f32[4,128], index: 3, kind: input, shape index: {}]   ;;  %s509_s4 = inlined_call_operand.vmem [shape: f32[8,128], index: 4, kind: output, shape index: {}, may-alias: {0,4}]  }
   0x1   :  { %s19_s16 = sshll.u32 %s416_s15, 4  ;;  %s20_s16 = int_to_ptr.vmem [resolvable:$true] %s19_s16 }
   0x2   :  { %s402_s17 = scalar_lea.vmem %s20_s16, 1024  ;;  %p407_p1 = scmp.lt.s32.totalorder %s20_s16, %s20_s16 }
   0x3   :  { %p403_p0 = scmp.ne.s32.totalorder %s20_s16, %s402_s17  ;;  %p408_p2 = scmp.lt.s32.totalorder %s402_s17, %s402_s17 }
   0x5   :  { %p409_p3 = por %p408_p2, %p407_p1 }
   0x7   :  { %p410_p4 = pnand %p409_p3, %p403_p0 }
   0x9   :  { %413 = shalt.err (!%p410_p4)
}
   0xa   :  { %s417_s18 = smov 64   ;;  %s418_s19 = smov 4  }
   0xb   :  { %25 = dma.hbm_to_vmem [thread:$0]  %s507_s2, 1024, %s20_s16, [#allocation3], %s417_s18, %s417_s18, %s418_s19  }
   0xc   :  { %414 = dma.done.wait [#allocation3], 1024  }
   0xd   :  { %415 = vsyncadd [#allocation3], 4294966272  ;;  %v452_v0 = vld [vmem:[%s505_s0] sm:$0xff]  ;;  %v374_v1 = vld [vmem:[%s506_s1 + $0x38] sm:$0xff]   ;;  %v419_v2 = vmov 0.0   ;;  %vm420_vm0 = vmmov 0   ;;  %v46_v17 = vlaneseq }
   0xe   :  { %34 = vadd.xlane.f32.xlu0 %v452_v0  ;;  %329 = vmatprep.subr.bf16.mxu0 %v419_v2  ;;  %v375_v7 = vld [vmem:[%s506_s1 + $0x30] sm:$0xff]   ;;  %v376_v8 = vld [vmem:[%s506_s1 + $0x28] sm:$0xff]   ;;  %v377_v9 = vld [vmem:[%s506_s1 + $0x20] sm:$0xff]  }
   0xf   :  { %349 = vmatprep.subr.bf16.mxu1 %v419_v2  ;;  %330 = vmatpush3.bf16.msra.mxu0 %v374_v1  ;;  %v378_v10 = vld [vmem:[%s506_s1 + $0x18] sm:$0xff]   ;;  %v379_v11 = vld [vmem:[%s506_s1 + $0x10] sm:$0xff]   ;;  %v380_v12 = vld [vmem:[%s506_s1 + $0x8] sm:$0xff]   ;;  %v47_v18 = vshrl.u32 %v46_v17, 7 }
  0x10   :  { %331 = vmatprep.subr.bf16.mxu0 %v419_v2  ;;  %345 = vmatprep.mubr.msk.bf16.mxu0 %vm420_vm0, %v419_v2  ;;  %v381_v13 = vld [vmem:[%s506_s1] sm:$0xff]   ;;  %v382_v34 = vld [vmem:[#allocation2 + $0x38] sm:$0xff]   ;;  %v383_v39 = vld [vmem:[#allocation2 + $0x30] sm:$0xff]  }
  0x11   :  { %365 = vmatprep.mubr.msk.bf16.mxu1 %vm420_vm0, %v419_v2  ;;  %v48_v19 = vsub.s32 0, %v47_v18  ;;  %v33_v20 = vld [vmem:[%s508_s3] sm:$0xf]  ;;  %v53_v21 = vsub.s32 1, %v47_v18  ;;  %350 = vmatpush3.bf16.msra.mxu1 %v382_v34  ;;  %v384_v40 = vld [vmem:[#allocation2 + $0x28] sm:$0xff]   ;;  %v386_v42 = vld [vmem:[#allocation2 + $0x18] sm:$0xff]  }
  0x12   :  { %351 = vmatprep.subr.bf16.mxu1 %v419_v2  ;;  %v385_v41 = vld [vmem:[#allocation2 + $0x20] sm:$0xff]   ;;  %v387_v43 = vld [vmem:[#allocation2 + $0x10] sm:$0xff]   ;;  %v388_v44 = vld [vmem:[#allocation2 + $0x8] sm:$0xff]   ;;  %v175_v49 = vsub.s32 2, %v47_v18  ;;  %v180_v50 = vsub.s32 3, %v47_v18 }
  0x13   :  { %332 = vmatpush3.bf16.msra.mxu0 %v375_v7  ;;  %v49_v22 = vrot.slane %v33_v20, %v48_v19  ;;  %v54_v25 = vrot.slane %v33_v20, %v53_v21  ;;  %v389_v45 = vld [vmem:[#allocation2] sm:$0xff]  }
  0x14   :  { %333 = vmatprep.subr.bf16.mxu0 %v419_v2  ;;  %v176_v51 = vrot.slane %v33_v20, %v175_v49  ;;  %v181_v54 = vrot.slane %v33_v20, %v180_v50 }
  0x15   :  { %352 = vmatpush3.bf16.msra.mxu1 %v383_v39 }
  0x16   :  { %353 = vmatprep.subr.bf16.mxu1 %v419_v2 }
  0x17   :  { %334 = vmatpush3.bf16.msra.mxu0 %v376_v8 }
  0x18   :  { %335 = vmatprep.subr.bf16.mxu0 %v419_v2 }
  0x19   :  { %354 = vmatpush3.bf16.msra.mxu1 %v384_v40 }
  0x1a   :  { %355 = vmatprep.subr.bf16.mxu1 %v419_v2 }
  0x1b   :  { %336 = vmatpush3.bf16.msra.mxu0 %v377_v9 }
  0x1c   :  { %337 = vmatprep.subr.bf16.mxu0 %v419_v2 }
  0x1d   :  { %356 = vmatpush3.bf16.msra.mxu1 %v385_v41 }
  0x1e   :  { %357 = vmatprep.subr.bf16.mxu1 %v419_v2 }
  0x1f   :  { %338 = vmatpush3.bf16.msra.mxu0 %v378_v10 }
  0x20   :  { %339 = vmatprep.subr.bf16.mxu0 %v419_v2 }
  0x21   :  { %358 = vmatpush3.bf16.msra.mxu1 %v386_v42 }
  0x22   :  { %359 = vmatprep.subr.bf16.mxu1 %v419_v2 }
  0x23   :  { %340 = vmatpush3.bf16.msra.mxu0 %v379_v11 }
  0x24   :  { %341 = vmatprep.subr.bf16.mxu0 %v419_v2 }
  0x25   :  { %360 = vmatpush3.bf16.msra.mxu1 %v387_v43 }
  0x26   :  { %361 = vmatprep.subr.bf16.mxu1 %v419_v2 }
  0x27   :  { %342 = vmatpush3.bf16.msra.mxu0 %v380_v12 }
  0x28   :  { %343 = vmatprep.subr.bf16.mxu0 %v419_v2 }
  0x29   :  { %362 = vmatpush3.bf16.msra.mxu1 %v388_v44 }
  0x2a   :  { %363 = vmatprep.subr.bf16.mxu1 %v419_v2 }
  0x2b   :  { %344 = vmatpush3.bf16.msra.mxu0 %v381_v13 }
  0x2d   :  { %364 = vmatpush3.bf16.msra.mxu1 %v389_v45 }
  0x97   :  { %v35_v3 = vpop.xlane.xlu0 %34 }
  0x98   :  { %v37_v4 = vmul.f32 0.0078125, %v35_v3 }
  0x9a   :  { %v38_v5 = vsub.f32 %v452_v0, %v37_v4 }
  0x9c   :  { %v39_v6 = vmul.f32 %v38_v5, %v38_v5 }
  0x9e   :  { %40 = vadd.xlane.f32.xlu0 %v39_v6 }
 0x127   :  { %v41_v14 = vpop.xlane.xlu0 %40 }
 0x128   :  { %v42_v15 = vmul.f32 0.0078125, %v41_v14 }
 0x12a   :  { %v43_v16 = vadd.f32 1e-05, %v42_v15 }
 0x12c   :  { %390 = vrsqrt.f32 %v43_v16 }
 0x139   :  { %v391_v23 = vpop.eup %390 }
 0x13a   :  { %v45_v24 = vmul.f32 %v391_v23, %v38_v5 }
 0x13c   :  { %v50_v26 = vmul.f32 %v49_v22, %v45_v24 }
 0x13e   :  { %v55_v27 = vadd.f32 %v54_v25, %v50_v26 }
 0x140   :  { %v56_v28 = vmax.f32 %v55_v27, 0.0 }
 0x142   :  { %v57_v29 = vpack.c.bf16 %v56_v28, %v56_v28 }
 0x144   :  { %346 = vmatmul.mubr.bf16.vlgmr.msra.gmra.mxu0 %v57_v29 }
 0x204   :  { %v156_v30 = vpop.f32.mrf.mxu0 }
 0x205   :  { %162 = vadd.xlane.f32.xlu1 %v156_v30 }
 0x206   :  { %v347_v31 = vpop.f32.mrf.mxu0 }
 0x208   :  { %v159_v32 = vpop.f32.mrf.mxu0 }
 0x20a   :  { %v348_v33 = vpop.f32.mrf.mxu0 }
 0x28e   :  { %v163_v35 = vpop.xlane.xlu1 %162 }
 0x28f   :  { %v164_v36 = vmul.f32 0.0078125, %v163_v35 }
 0x291   :  { %v165_v37 = vsub.f32 %v156_v30, %v164_v36 }
 0x293   :  { %v166_v38 = vmul.f32 %v165_v37, %v165_v37 }
 0x295   :  { %167 = vadd.xlane.f32.xlu1 %v166_v38 }
 0x31e   :  { %v168_v46 = vpop.xlane.xlu1 %167 }
 0x31f   :  { %v169_v47 = vmul.f32 0.0078125, %v168_v46 }
 0x321   :  { %v170_v48 = vadd.f32 1e-05, %v169_v47 }
 0x323   :  { %392 = vrsqrt.f32 %v170_v48 }
 0x330   :  { %v393_v52 = vpop.eup %392 }
 0x331   :  { %v172_v53 = vmul.f32 %v393_v52, %v165_v37 }
 0x333   :  { %v177_v55 = vmul.f32 %v176_v51, %v172_v53 }
 0x335   :  { %v182_v56 = vadd.f32 %v181_v54, %v177_v55 }
 0x337   :  { %v183_v57 = vmax.f32 %v182_v56, 0.0 }
 0x339   :  { %v184_v58 = vpack.c.bf16 %v183_v57, %v183_v57 }
 0x33b   :  { %366 = vmatmul.mubr.bf16.vlgmr.msra.gmra.mxu1 %v184_v58 }
 0x3fb   :  { %v283_v59 = vpop.f32.mrf.mxu1 }
 0x3fc   :  { %v284_v60 = vadd.f32 %v283_v59, %v452_v0 }
 0x3fd   :  { %v367_v61 = vpop.f32.mrf.mxu1 }
 0x3fe   :  { %289 = vst [vmem:[%s509_s4] sm:$0xff] %v284_v60 }
 0x3ff   :  { %v286_v62 = vpop.f32.mrf.mxu1 }
 0x401   :  { %v368_v63 = vpop.f32.mrf.mxu1 }
 0x402   :  { %294 = vsyncpa [#allocation3], 1 }

</bundles_post_ra>
